<compile_context>
chip_gen: v7x
topology: tpu7x:2x2x1
jax: 0.10.0
libtpu: 0.0.40
codegen_flags: <defaults>
</compile_context>

<pallas_src>
import jax
import jax.numpy as jnp
from jax.experimental import pallas as pl
from jax.experimental.pallas import tpu as pltpu

_W_PAD_MULTIPLE = 512  # vocab padding granularity of the precomputed bf16 weight


def _round_up(x: int, m: int) -> int:
    return (x + m - 1) // m * m


def _default_tile_n() -> int:
    """Generation-aware default row tile.

    v6e/v7x: MXU/HBM crossover ~620-690 FLOPs per byte of streamed W -> 1024.
    v5e (and unknown/older chips): crossover ~240 and only 16 MiB default
    scoped VMEM -> stay at 256.
    """
    try:
        kind = jax.devices()[0].device_kind.lower()
    except Exception:
        return 256
    if ("v6" in kind) or ("v7" in kind) or ("7x" in kind):
        return 1024
    return 256


def _make_lm_crit_kernel(tile_v: int, v_true: int, v_pad: int):
    """Fused masked-NLL head with vocab-tiled online softmax."""
    mask_vocab_pad = (v_pad != v_true)

    def kernel(nnz_ref, h_ref, w_ref, tgt_ref, msk_ref, nll_ref, m_sc, l_sc, t_sc):
        i = pl.program_id(0)            # row-tile index (parallel)
        j = pl.program_id(1)            # vocab-tile index (reduction)
        nv = pl.num_programs(1)
        active = nnz_ref[i] > 0         # skip fully-masked / padded row tiles

        @pl.when(jnp.logical_and(active, j == 0))
        def _():
            m_sc[...] = jnp.full_like(m_sc, -jnp.inf)
            l_sc[...] = jnp.zeros_like(l_sc)
            t_sc[...] = jnp.zeros_like(t_sc)

        @pl.when(active)
        def _():
            # bf16 MXU matmul with f32 accumulation: (TN, H) @ (H, TV)
            logits = jnp.dot(h_ref[...], w_ref[...],
                             preferred_element_type=jnp.float32)
            # relative lane iota 0..tile_v-1; compare against tile-relative
            # bounds instead of adding j*tile_v to the full tile.
            col_rel = jax.lax.broadcasted_iota(jnp.int32, logits.shape, 1)
            base = j * tile_v
            if mask_vocab_pad:
                # Padded vocab columns (>= V) must not feed the softmax sum.
                # NOTE: f32 only — keep the -1e30 sentinel out of bf16.  The
                # padding can span several vocab tiles (W is pre-padded to a
                # 512 multiple), so this is NOT gated on the last tile.
                logits = jnp.where(col_rel < (v_true - base), logits, -1e30)

            # online softmax state update (f32)
            m_prev = m_sc[...]
            m_new = jnp.maximum(m_prev, jnp.max(logits, axis=-1, keepdims=True))
            l_sc[...] = (l_sc[...] * jnp.exp(m_prev - m_new)
                         + jnp.sum(jnp.exp(logits - m_new), axis=-1, keepdims=True))
            m_sc[...] = m_new

            # gather target logit in this vocab tile via tile-relative compare
            # (assumes every target index < V; padded rows use target 0).
            t_sc[...] += jnp.sum(
                jnp.where(col_rel == (tgt_ref[...] - base), logits, 0.0),
                axis=-1, keepdims=True)

        @pl.when(j == nv - 1)
        def _():
            @pl.when(active)
            def _():
                lse = m_sc[...] + jnp.log(l_sc[...])
                nll_ref[...] = (lse - t_sc[...]) * msk_ref[...]

            @pl.when(jnp.logical_not(active))
            def _():
                nll_ref[...] = jnp.zeros_like(nll_ref)

    return kernel


def language_model_criterion(hidden, w_p, v_true, targets, masks,
                             *, tile_n=None, tile_v=512):
    """hidden: (N, H) f32, w_p: (H, v_pad) bf16 (pre-padded weight), v_true: int
    true vocab size, targets: (N, 1) i32, masks: (N, 1) f32.
    Returns scalar masked NLL = sum(-logp[target]*mask) / sum(mask)."""
    N, H = hidden.shape
    Hw, v_pad = w_p.shape
    assert H == Hw
    assert w_p.dtype == jnp.bfloat16

    if tile_n is None:
        tile_n = _default_tile_n()

    # vocab tile must evenly divide the precomputed padded vocab
    tile_v = min(tile_v, v_pad)
    assert v_pad % tile_v == 0, "tile_v must divide the padded vocab width"

    # clamp the row tile for small problems (bf16-friendly sublane multiple)
    tile_n = _round_up(min(tile_n, _round_up(N, 16)), 16)
    # keep >= 2 row tiles when there is enough work so the "parallel" row axis
    # can actually split across both v7x TensorCores
    if N > 256 and tile_n >= N:
        tile_n = max(256, _round_up(pl.cdiv(N, 2), 256))

    n_pad = _round_up(N, tile_n)
    n_row_tiles = n_pad // tile_n
    n_voc_tiles = v_pad // tile_v

    # bf16 MXU inputs for the activations (softmax / accumulation stay f32
    # inside the kernel).  Row padding carries mask=0 and an in-range target
    # (0), so it contributes 0.  W is already padded + bf16 (done once).
    h_p = jnp.zeros((n_pad, H), jnp.bfloat16).at[:N].set(hidden.astype(jnp.bfloat16))
    t_p = jnp.zeros((n_pad, 1), jnp.int32).at[:N].set(targets.astype(jnp.int32))
    m_p = jnp.zeros((n_pad, 1), jnp.float32).at[:N].set(masks.astype(jnp.float32))

    # per-row-tile "has any unmasked row" flags (scalar prefetch -> SMEM)
    tile_nnz = (m_p.reshape(n_row_tiles, tile_n).sum(axis=1) > 0).astype(jnp.int32)

    kernel = _make_lm_crit_kernel(tile_v, v_true, v_pad)

    nll = pl.pallas_call(
        kernel,
        out_shape=jax.ShapeDtypeStruct((n_pad, 1), jnp.float32),
        grid_spec=pltpu.PrefetchScalarGridSpec(
            num_scalar_prefetch=1,
            grid=(n_row_tiles, n_voc_tiles),
            in_specs=[
                # hidden rows: resident across the vocab loop
                pl.BlockSpec((tile_n, H), lambda i, j, nnz: (i, 0)),
                # vocab-tiled weights (streamed).  For inactive row tiles the
                # block index is pinned to (0, 0) across j so Pallas skips the
                # re-fetch -> the nnz skip saves the dominant W HBM traffic.
                pl.BlockSpec((H, tile_v),
                             lambda i, j, nnz: (0, jnp.where(nnz[i] > 0, j, 0))),
                pl.BlockSpec((tile_n, 1), lambda i, j, nnz: (i, 0)),  # targets
                pl.BlockSpec((tile_n, 1), lambda i, j, nnz: (i, 0)),  # masks
            ],
            out_specs=pl.BlockSpec((tile_n, 1), lambda i, j, nnz: (i, 0)),
            scratch_shapes=[
                pltpu.VMEM((tile_n, 1), jnp.float32),   # running max
                pltpu.VMEM((tile_n, 1), jnp.float32),   # running sum-exp
                pltpu.VMEM((tile_n, 1), jnp.float32),   # running target logit
            ],
        ),
        compiler_params=pltpu.CompilerParams(
            dimension_semantics=("parallel", "arbitrary")),
    )(tile_nnz, h_p, h_p.dtype.type(0) * 0 + w_p if False else w_p, t_p, m_p)

    # final reduction in plain JAX; unguarded division matches the PyTorch
    # LanguageModelCriterion semantics (NaN if every mask is zero).
    return jnp.sum(nll) / jnp.sum(masks.astype(jnp.float32))


class LossWrapperPallas:
    """Synthetic JAX/Pallas re-implementation of LossWrapper's default branch."""

    def __init__(self, key, *, fc_dim, att_dim, hidden, vocab):
        k1, k2, k3, k4 = jax.random.split(key, 4)
        scale = 0.02
        self.w_fc = (scale * jax.random.normal(k1, (fc_dim, hidden))).astype(jnp.float32)
        self.w_att = (scale * jax.random.normal(k2, (att_dim, hidden))).astype(jnp.float32)
        self.emb = (scale * jax.random.normal(k3, (vocab, hidden))).astype(jnp.float32)
        self.w_out = (scale * jax.random.normal(k4, (hidden, vocab))).astype(jnp.float32)
        self.vocab = vocab
        # precompute the padded bf16 projection weight ONCE (no per-forward
        # re-cast / re-pad HBM traffic over the (H, V) matrix)
        v_pad = _round_up(vocab, _W_PAD_MULTIPLE)
        self.w_out_p = (jnp.zeros((hidden, v_pad), jnp.bfloat16)
                        .at[:, :vocab].set(self.w_out.astype(jnp.bfloat16)))

    def _model(self, fc_feats, att_feats, labels, att_masks):
        # glue (plain JAX): feature projection + masked mean-pool of att feats
        # + input-token embedding -> per-step decoder hidden states.
        B, Tp1 = labels.shape
        ctx = jnp.tanh(fc_feats @ self.w_fc)                                  # (B, H)
        att_pool = (att_feats * att_masks[..., None]).sum(1) / (
            att_masks.sum(1, keepdims=True) + 1e-6)                           # (B, A_dim)
        ctx = ctx + jnp.tanh(att_pool @ self.w_att)                           # (B, H)
        tok = self.emb[labels[:, :-1]]                                        # (B, T, H)
        hidden = jnp.tanh(ctx[:, None, :] + tok)                              # (B, T, H)
        return hidden.reshape(B * (Tp1 - 1), -1)                              # (N, H)

    def forward(self, fc_feats, att_feats, labels, masks, att_masks,
                *, tile_n=None, tile_v=512):
        out = {}
        hidden = self._model(fc_feats, att_feats, labels, att_masks)          # (N, H)
        tgt = labels[:, 1:].reshape(-1, 1).astype(jnp.int32)                  # (N, 1)
        msk = masks[:, 1:].reshape(-1, 1).astype(jnp.float32)                 # (N, 1)
        loss = language_model_criterion(hidden, self.w_out_p, self.vocab, tgt,
                                        msk, tile_n=tile_n, tile_v=tile_v)
        out["loss"] = loss
        return out


if __name__ == "__main__":
    key = jax.random.PRNGKey(0)
    kf, ka, kl, km, kw = jax.random.split(key, 5)

    # small shapes; V=300 is deliberately far from the 512-multiple weight pad
    # so multiple (partially and fully) padded vocab tiles are exercised.
    B, T, F, A, ADIM, H, V = 4, 8, 64, 16, 64, 128, 300

    fc_feats = jax.random.normal(kf, (B, F), dtype=jnp.float32)
    att_feats = jax.random.normal(ka, (B, A, ADIM), dtype=jnp.float32)
    labels = jax.random.randint(kl, (B, T + 1), 0, V, dtype=jnp.int32)
    mask_lens = jax.random.randint(km, (B,), 3, T + 1)
    masks = (jnp.arange(T + 1)[None, :] < mask_lens[:, None] + 1).astype(jnp.float32)
    # fully mask out the last two sequences -> exercises the inactive-row-tile
    # path (compute skip AND pinned weight block index / skipped W DMA)
    masks = masks.at[2:, 1:].set(0.0)
    att_masks = jnp.ones((B, A), dtype=jnp.float32)

    wrapper = LossWrapperPallas(kw, fc_dim=F, att_dim=ADIM, hidden=H, vocab=V)
    # small tiles here so the demo exercises multiple row tiles AND multiple
    # vocab tiles; production callers keep the generation-aware defaults
    # (tile_n=1024 on v6e/v7x, 256 on v5e; tile_v=512).
    out = wrapper.forward(fc_feats, att_feats, labels, masks, att_masks,
                          tile_n=16, tile_v=128)
    loss = jax.block_until_ready(out["loss"])

    # ---- references ----
    hidden = wrapper._model(fc_feats, att_feats, labels, att_masks)
    tgt = labels[:, 1:].reshape(-1)
    msk = masks[:, 1:].reshape(-1)

    # bf16-MXU-consistent reference (same dtype choices as the kernel)
    logits_bf = jnp.dot(hidden.astype(jnp.bfloat16),
                        wrapper.w_out.astype(jnp.bfloat16),
                        preferred_element_type=jnp.float32)
    lp_bf = jax.nn.log_softmax(logits_bf, axis=-1)
    ref_bf = jnp.sum(-lp_bf[jnp.arange(tgt.shape[0]), tgt] * msk) / jnp.sum(msk)

    # full-f32 reference (original module semantics)
    logits_f32 = hidden @ wrapper.w_out
    lp_f32 = jax.nn.log_softmax(logits_f32, axis=-1)
    ref_f32 = jnp.sum(-lp_f32[jnp.arange(tgt.shape[0]), tgt] * msk) / jnp.sum(msk)

    assert jnp.allclose(loss, ref_bf, rtol=2e-3, atol=2e-4), (loss, ref_bf)
    assert jnp.allclose(loss, ref_f32, rtol=2e-2, atol=2e-2), (loss, ref_f32)

    # also run once with the production-default (generation-aware) tiles to make
    # sure the large-tile config compiles and matches on this chip
    out_def = wrapper.forward(fc_feats, att_feats, labels, masks, att_masks)
    loss_def = jax.block_until_ready(out_def["loss"])
    assert jnp.allclose(loss_def, ref_bf, rtol=2e-3, atol=2e-4), (loss_def, ref_bf)

    print("KERNEL_OK")
</pallas_src>

<mosaic_0001>
module attributes {stable_mosaic.version = 11 : i64} {
  func.func @kernel(%arg0: i32, %arg1: i32, %arg2: memref<2xi32, #tpu.memory_space<smem>>, %arg3: memref<16x128xbf16, #tpu.memory_space<vmem>>, %arg4: memref<128x128xbf16, #tpu.memory_space<vmem>>, %arg5: memref<16x1xi32, #tpu.memory_space<vmem>>, %arg6: memref<16x1xf32, #tpu.memory_space<vmem>>, %arg7: memref<16x1xf32, #tpu.memory_space<vmem>>, %arg8: memref<16x1xf32, #tpu.memory_space<vmem>>, %arg9: memref<16x1xf32, #tpu.memory_space<vmem>>, %arg10: memref<16x1xf32, #tpu.memory_space<vmem>>) attributes {dimension_semantics = [#tpu.dimension_semantics<parallel>, #tpu.dimension_semantics<arbitrary>], iteration_bounds = array<i64: 2, 4>, scalar_prefetch = 1 : i64, scratch_operands = 3 : i64, tpu.core_type = #tpu.core_type<tc>, window_params = [{transform_indices = @transform_0, window_bounds = array<i64: 16, 128>}, {transform_indices = @transform_1, window_bounds = array<i64: 128, 128>}, {transform_indices = @transform_2, window_bounds = array<i64: 16, 1>}, {transform_indices = @transform_3, window_bounds = array<i64: 16, 1>}, {transform_indices = @transform_4, window_bounds = array<i64: 16, 1>}]} {
    %0 = arith.index_cast %arg0 : i32 to index
    %1 = memref.load %arg2[%0] : memref<2xi32, #tpu.memory_space<smem>>
    %c0_i32 = arith.constant 0 : i32
    %2 = arith.cmpi sgt, %1, %c0_i32 : i32
    %c0_i32_0 = arith.constant 0 : i32
    %3 = arith.cmpi eq, %arg1, %c0_i32_0 : i32
    %4 = arith.andi %2, %3 : i1
    %5 = arith.extui %4 : i1 to i32
    %c0_i32_1 = arith.constant 0 : i32
    %6 = arith.cmpi ne, %5, %c0_i32_1 : i32
    scf.if %6 {
      %cst = arith.constant 0xFF800000 : f32
      %12 = vector.broadcast %cst : f32 to vector<16x1xf32>
      %c0 = arith.constant 0 : index
      %c0_4 = arith.constant 0 : index
      %13 = vector.load %arg8[%c0, %c0_4] : memref<16x1xf32, #tpu.memory_space<vmem>>, vector<16x1xf32>
      tpu.vector_store %arg8[%c0, %c0_4], %12 {strides = array<i32>} : memref<16x1xf32, #tpu.memory_space<vmem>>, vector<16x1xf32>,
      %cst_5 = arith.constant 0.000000e+00 : f32
      %14 = vector.broadcast %cst_5 : f32 to vector<16x1xf32>
      %c0_6 = arith.constant 0 : index
      %c0_7 = arith.constant 0 : index
      %15 = vector.load %arg9[%c0_6, %c0_7] : memref<16x1xf32, #tpu.memory_space<vmem>>, vector<16x1xf32>
      tpu.vector_store %arg9[%c0_6, %c0_7], %14 {strides = array<i32>} : memref<16x1xf32, #tpu.memory_space<vmem>>, vector<16x1xf32>,
      %cst_8 = arith.constant 0.000000e+00 : f32
      %16 = vector.broadcast %cst_8 : f32 to vector<16x1xf32>
      %c0_9 = arith.constant 0 : index
      %c0_10 = arith.constant 0 : index
      %17 = vector.load %arg10[%c0_9, %c0_10] : memref<16x1xf32, #tpu.memory_space<vmem>>, vector<16x1xf32>
      tpu.vector_store %arg10[%c0_9, %c0_10], %16 {strides = array<i32>} : memref<16x1xf32, #tpu.memory_space<vmem>>, vector<16x1xf32>,
    } else {
    }
    %7 = arith.extui %2 : i1 to i32
    %c0_i32_2 = arith.constant 0 : i32
    %8 = arith.cmpi ne, %7, %c0_i32_2 : i32
    scf.if %8 {
      %c0 = arith.constant 0 : index
      %c0_4 = arith.constant 0 : index
      %12 = vector.load %arg3[%c0, %c0_4] : memref<16x128xbf16, #tpu.memory_space<vmem>>, vector<16x128xbf16>
      %c0_5 = arith.constant 0 : index
      %c0_6 = arith.constant 0 : index
      %13 = vector.load %arg4[%c0_5, %c0_6] : memref<128x128xbf16, #tpu.memory_space<vmem>>, vector<128x128xbf16>
      %cst = arith.constant dense<0.000000e+00> : vector<16x128xf32>
      %14 = tpu.matmul %12, %13, %cst {dimension_numbers = #tpu.dot_dimension_numbers<[1], [0], [0], [1], [0, 0, 1, 1], [], []>} : vector<16x128xbf16>, vector<128x128xbf16>, vector<16x128xf32> -> vector<16x128xf32>
      %15 = tpu.iota {dimensions = array<i32: 1>} : vector<16x128xi32>
      %c128_i32 = arith.constant 128 : i32
      %16 = arith.muli %arg1, %c128_i32 : i32
      %c300_i32 = arith.constant 300 : i32
      %17 = arith.subi %c300_i32, %16 : i32
      %18 = vector.broadcast %17 : i32 to vector<16x128xi32>
      %19 = arith.cmpi slt, %15, %18 : vector<16x128xi32>
      %cst_7 = arith.constant -1.000000e+30 : f32
      %20 = vector.broadcast %cst_7 : f32 to vector<16x128xf32>
      %21 = arith.select %19, %14, %20 : vector<16x128xi1>, vector<16x128xf32>
      %c0_8 = arith.constant 0 : index
      %c0_9 = arith.constant 0 : index
      %22 = vector.load %arg8[%c0_8, %c0_9] : memref<16x1xf32, #tpu.memory_space<vmem>>, vector<16x1xf32>
      %cst_10 = arith.constant dense<0xFF800000> : vector<16xf32>
      %23 = vector.multi_reduction <maximumf>, %21, %cst_10 [1] : vector<16x128xf32> to vector<16xf32>
      %24 = vector.shape_cast %23 : vector<16xf32> to vector<16x1xf32>
      %25 = arith.maximumf %22, %24 : vector<16x1xf32>
      %c0_11 = arith.constant 0 : index
      %c0_12 = arith.constant 0 : index
      %26 = vector.load %arg9[%c0_11, %c0_12] : memref<16x1xf32, #tpu.memory_space<vmem>>, vector<16x1xf32>
      %27 = arith.subf %22, %25 : vector<16x1xf32>
      %28 = math.exp %27 : vector<16x1xf32>
      %29 = arith.mulf %26, %28 : vector<16x1xf32>
      %30 = vector.broadcast %25 : vector<16x1xf32> to vector<16x128xf32>
      %31 = arith.subf %21, %30 : vector<16x128xf32>
      %32 = math.exp %31 : vector<16x128xf32>
      %cst_13 = arith.constant dense<0.000000e+00> : vector<16xf32>
      %33 = vector.multi_reduction <add>, %32, %cst_13 [1] : vector<16x128xf32> to vector<16xf32>
      %34 = vector.shape_cast %33 : vector<16xf32> to vector<16x1xf32>
      %35 = arith.addf %29, %34 : vector<16x1xf32>
      %c0_14 = arith.constant 0 : index
      %c0_15 = arith.constant 0 : index
      %36 = vector.load %arg9[%c0_14, %c0_15] : memref<16x1xf32, #tpu.memory_space<vmem>>, vector<16x1xf32>
      tpu.vector_store %arg9[%c0_14, %c0_15], %35 {strides = array<i32>} : memref<16x1xf32, #tpu.memory_space<vmem>>, vector<16x1xf32>,
      %c0_16 = arith.constant 0 : index
      %c0_17 = arith.constant 0 : index
      %37 = vector.load %arg8[%c0_16, %c0_17] : memref<16x1xf32, #tpu.memory_space<vmem>>, vector<16x1xf32>
      tpu.vector_store %arg8[%c0_16, %c0_17], %25 {strides = array<i32>} : memref<16x1xf32, #tpu.memory_space<vmem>>, vector<16x1xf32>,
      %c0_18 = arith.constant 0 : index
      %c0_19 = arith.constant 0 : index
      %38 = vector.load %arg10[%c0_18, %c0_19] : memref<16x1xf32, #tpu.memory_space<vmem>>, vector<16x1xf32>
      %c0_20 = arith.constant 0 : index
      %c0_21 = arith.constant 0 : index
      %39 = vector.load %arg5[%c0_20, %c0_21] : memref<16x1xi32, #tpu.memory_space<vmem>>, vector<16x1xi32>
      %40 = vector.broadcast %16 : i32 to vector<16x1xi32>
      %41 = arith.subi %39, %40 : vector<16x1xi32>
      %42 = vector.broadcast %41 : vector<16x1xi32> to vector<16x128xi32>
      %43 = arith.cmpi eq, %15, %42 : vector<16x128xi32>
      %cst_22 = arith.constant 0.000000e+00 : f32
      %44 = vector.broadcast %cst_22 : f32 to vector<16x128xf32>
      %45 = arith.select %43, %21, %44 : vector<16x128xi1>, vector<16x128xf32>
      %cst_23 = arith.constant dense<0.000000e+00> : vector<16xf32>
      %46 = vector.multi_reduction <add>, %45, %cst_23 [1] : vector<16x128xf32> to vector<16xf32>
      %47 = vector.shape_cast %46 : vector<16xf32> to vector<16x1xf32>
      %48 = arith.addf %38, %47 : vector<16x1xf32>
      %c0_24 = arith.constant 0 : index
      %c0_25 = arith.constant 0 : index
      %49 = vector.load %arg10[%c0_24, %c0_25] : memref<16x1xf32, #tpu.memory_space<vmem>>, vector<16x1xf32>
      tpu.vector_store %arg10[%c0_24, %c0_25], %48 {strides = array<i32>} : memref<16x1xf32, #tpu.memory_space<vmem>>, vector<16x1xf32>,
    } else {
    }
    %c3_i32 = arith.constant 3 : i32
    %9 = arith.cmpi eq, %arg1, %c3_i32 : i32
    %10 = arith.extui %9 : i1 to i32
    %c0_i32_3 = arith.constant 0 : i32
    %11 = arith.cmpi ne, %10, %c0_i32_3 : i32
    scf.if %11 {
      %12 = arith.extui %2 : i1 to i32
      %c0_i32_4 = arith.constant 0 : i32
      %13 = arith.cmpi ne, %12, %c0_i32_4 : i32
      scf.if %13 {
        %c0 = arith.constant 0 : index
        %c0_6 = arith.constant 0 : index
        %17 = vector.load %arg8[%c0, %c0_6] : memref<16x1xf32, #tpu.memory_space<vmem>>, vector<16x1xf32>
        %c0_7 = arith.constant 0 : index
        %c0_8 = arith.constant 0 : index
        %18 = vector.load %arg9[%c0_7, %c0_8] : memref<16x1xf32, #tpu.memory_space<vmem>>, vector<16x1xf32>
        %19 = math.log %18 : vector<16x1xf32>
        %20 = arith.addf %17, %19 : vector<16x1xf32>
        %c0_9 = arith.constant 0 : index
        %c0_10 = arith.constant 0 : index
        %21 = vector.load %arg10[%c0_9, %c0_10] : memref<16x1xf32, #tpu.memory_space<vmem>>, vector<16x1xf32>
        %22 = arith.subf %20, %21 : vector<16x1xf32>
        %c0_11 = arith.constant 0 : index
        %c0_12 = arith.constant 0 : index
        %23 = vector.load %arg6[%c0_11, %c0_12] : memref<16x1xf32, #tpu.memory_space<vmem>>, vector<16x1xf32>
        %24 = arith.mulf %22, %23 : vector<16x1xf32>
        %c0_13 = arith.constant 0 : index
        %c0_14 = arith.constant 0 : index
        %25 = vector.load %arg7[%c0_13, %c0_14] : memref<16x1xf32, #tpu.memory_space<vmem>>, vector<16x1xf32>
        tpu.vector_store %arg7[%c0_13, %c0_14], %24 {strides = array<i32>} : memref<16x1xf32, #tpu.memory_space<vmem>>, vector<16x1xf32>,
      } else {
      }
      %true = arith.constant true
      %14 = arith.xori %2, %true : i1
      %15 = arith.extui %14 : i1 to i32
      %c0_i32_5 = arith.constant 0 : i32
      %16 = arith.cmpi ne, %15, %c0_i32_5 : i32
      scf.if %16 {
        %cst = arith.constant 0.000000e+00 : f32
        %17 = vector.broadcast %cst : f32 to vector<16x1xf32>
        %c0 = arith.constant 0 : index
        %c0_6 = arith.constant 0 : index
        %18 = vector.load %arg7[%c0, %c0_6] : memref<16x1xf32, #tpu.memory_space<vmem>>, vector<16x1xf32>
        tpu.vector_store %arg7[%c0, %c0_6], %17 {strides = array<i32>} : memref<16x1xf32, #tpu.memory_space<vmem>>, vector<16x1xf32>,
      } else {
      }
    } else {
    }
    return
  }
  func.func @transform_0(%arg0: i32, %arg1: i32, %arg2: memref<2xi32, #tpu.memory_space<smem>>) -> (i32, i32) {
    %c0_i32 = arith.constant 0 : i32
    %c0_i32_0 = arith.constant 0 : i32
    return %arg0, %c0_i32 : i32, i32
  }
  func.func @transform_1(%arg0: i32, %arg1: i32, %arg2: memref<2xi32, #tpu.memory_space<smem>>) -> (i32, i32) {
    %0 = arith.index_cast %arg0 : i32 to index
    %1 = memref.load %arg2[%0] : memref<2xi32, #tpu.memory_space<smem>>
    %c0_i32 = arith.constant 0 : i32
    %2 = arith.cmpi sgt, %1, %c0_i32 : i32
    %c0_i32_0 = arith.constant 0 : i32
    %3 = arith.select %2, %arg1, %c0_i32_0 : i32
    %c0_i32_1 = arith.constant 0 : i32
    %c0_i32_2 = arith.constant 0 : i32
    return %c0_i32_1, %3 : i32, i32
  }
  func.func @transform_2(%arg0: i32, %arg1: i32, %arg2: memref<2xi32, #tpu.memory_space<smem>>) -> (i32, i32) {
    %c0_i32 = arith.constant 0 : i32
    %c0_i32_0 = arith.constant 0 : i32
    return %arg0, %c0_i32 : i32, i32
  }
  func.func @transform_3(%arg0: i32, %arg1: i32, %arg2: memref<2xi32, #tpu.memory_space<smem>>) -> (i32, i32) {
    %c0_i32 = arith.constant 0 : i32
    %c0_i32_0 = arith.constant 0 : i32
    return %arg0, %c0_i32 : i32, i32
  }
  func.func @transform_4(%arg0: i32, %arg1: i32, %arg2: memref<2xi32, #tpu.memory_space<smem>>) -> (i32, i32) {
    %c0_i32 = arith.constant 0 : i32
    %c0_i32_0 = arith.constant 0 : i32
    return %arg0, %c0_i32 : i32, i32
  }
}

</mosaic_0001>

<bundles_post_ra>
// kernel: tpu_custom_call.1
= control target key start
LH: loop header
LB: loop body
LE: loop exit
PB: predicated region body
PF: predicated region fallthrough
CT: control target
= control target key end

     0   :  { %s1221_s0 = inlined_call_operand.vmem [shape: s32[2], index: 0, kind: input, shape index: {}]   ;;  %s1222_s1 = inlined_call_operand.vmem [shape: bf16[32,128], index: 1, kind: input, shape index: {}]   ;;  %s1223_s2 = inlined_call_operand.hbm [shape: bf16[128,512], index: 2, kind: input, shape index: {}]   ;;  %s1224_s3 = inlined_call_operand.vmem [shape: s32[32,1], index: 3, kind: input, shape index: {}]   ;;  %s1225_s4 = inlined_call_operand.vmem [shape: f32[32,1], index: 4, kind: input, shape index: {}]   ;;  %s1226_s5 = inlined_call_operand.vmem [shape: f32[32,1], index: 5, kind: output, shape index: {}]  }
   0x1   :  { %s10_s20 = sshll.u32 %s1221_s0, 4  ;;  %s11_s20 = int_to_ptr.vmem [resolvable:$true] %s10_s20 }
   0x2   :  { %s843_s21 = scalar_lea.vmem %s11_s20, 16  ;;  %p848_p1 = scmp.lt.s32.totalorder %s11_s20, %s11_s20 }
   0x3   :  { %p844_p0 = scmp.ne.s32.totalorder %s11_s20, %s843_s21  ;;  %p849_p2 = scmp.lt.s32.totalorder %s843_s21, %s843_s21 }
   0x5   :  { %p850_p3 = por %p849_p2, %p848_p1 }
   0x7   :  { %p851_p4 = pnand %p850_p3, %p844_p0 }
   0x9   :  { %854 = shalt.err (!%p851_p4)  }
   0xa   :  { %s955_s22 = smov [#allocation6]  }
   0xb   :  { %13 = dma.vmem_to_smem %s11_s20, 16, %s955_s22, [#allocation5] }
   0xc   :  { %917 = dma.done.wait [#allocation5], 16 }
   0xd   :  { %918 = vsyncadd [#allocation5], 4294967280 }
   0xe   :  { %15 = sfence }
   0xf   :  { %16 = vsyncpa [#allocation8], 0 }
  0x10   :  { %18 = vsyncpa [#allocation8 + $0x1], 0  ;;  %s999_s23 = smov 0   ;;  %s1001_s24 = smov 0  }
  0x11   :  { %s1003_s0 = smov 0   ;;  %s1005_s25 = smov 0  }
  0x12   :  { %s1007_s26 = smov 0   ;;  %s1009_s27 = smov 0  }
  0x13   :  { %s1011_s28 = smov 0   ;;  %s1013_s29 = smov 0  }
  0x14 LB: > { %s33_s30 = sadd.s32 1, %s945_s27  ;;  %s36_s7 = sadd.s32 1, %s949_s28  ;;  %s953_s29 = sphi %s1013_s29, %s24_s29   ;;  %s949_s28 = sphi %s1011_s28, %s1240_s28   ;;  %s945_s27 = sphi %s1009_s27, %s1239_s27   ;;  %s941_s26 = sphi %s1007_s26, %s1238_s26   ;;  %s937_s25 = sphi %s1005_s25, %s1237_s25   ;;  %s933_s0 = sphi %s1003_s0, %s1236_s0   ;;  %s929_s24 = sphi %s1001_s24, %s1235_s24   ;;  %s925_s23 = sphi %s999_s23, %s1234_s23  }
  0x15   : > { %p1038_p5 = scmp.ge.s32.totalorder %s33_s30, 4  ;;  %s66_s8 = sld [smem:[#allocation6 + %s949_s28]] }
  0x16   : > { %s674_s9 = sadd.s32 4294967295, %s953_s29   ;;  %p82_p6 = scmp.ne.s32.totalorder %s933_s0, %s929_s24 }
  0x17   : > { %s1242_s7 = smov (!%p1038_p5, %s36_s7), %s949_s28  ;;  %p88_p8 = scmp.ne.s32.totalorder %s929_s24, %s925_s23 }
  0x18   : > { %p38_p7 = scmp.ge.s32.totalorder %s1242_s7, 2  ;;  %p83_p9 = scmp.eq.s32.totalorder %s953_s29, 0 }
  0x19   : > { %p89_p10 = scmp.eq.s32.totalorder %s674_s9, 0  ;;  %s75_s12 = sadd.s32 1, %s933_s0 }
  0x1a   : > { %s1244_s7 = smov (%p38_p7, %s1242_s7), 0  ;;  %p1060_p13 = por %p83_p9, %p82_p6 }
  0x1b   : > { %p67_p11 = scmp.gt.s32.totalorder %s66_s8, 0  ;;  %p1054_p12 = por %p89_p10, %p88_p8 }
  0x1c   : > { %s69_s11 = sld [smem:[#allocation6 + %s1244_s7]]  ;;  %s1246_s30 = smov (%p1038_p5, %s33_s30), 0 }
  0x1d   : > { %s1229_s10 = scalar_select %p1054_p12, 1, 0 }
  0x1e   : > { %s68_s14 = scalar_select %p67_p11, %s945_s27, 0 }
  0x1f   : > { %p745_p0 = scmp.lt.s32.totalorder %s953_s29, 8  ;;  %s199_s15 = sand.u32 1, %s933_s0  }
  0x20   : > { %s735_s16 = scalar_select %p1060_p13, [#allocation6], [#allocation9] }
  0x21   : > { %p1075_p2 = pnand %p745_p0, %p1060_p13  ;;  %s678_s21 = sshll.u32 %s199_s15, 6 }
  0x22   : > { %p70_p1 = scmp.gt.s32.totalorder %s69_s11, 0  ;;  %s1248_s16 = smov (!%p745_p0, %s735_s16), [#allocation10] }
  0x23   : > { %s736_s18 = scalar_select %p1060_p13, %s949_s28, 0 }
  0x24   : > { %s71_s19 = scalar_select %p70_p1, %s1246_s30, 0 }
  0x25   : > { %s1250_s18 = smov (!%p745_p0, %s736_s18), 0  ;;  %p680_p4 = scmp.ge.s32.totalorder %s953_s29, 1 }
  0x26   : > { %s72_s20 = ssub.s32 %s68_s14, %s71_s19  ;;  %s204_s23 = sld [smem:[%s1248_s16 + %s1250_s18]] }
  0x27   : > { %p73_p3 = scmp.eq.s32.totalorder %s72_s20, 0  ;;  %p238_p5 = scmp.lt.s32.totalorder %s953_s29, 9 }
  0x28   : > { %s203_s6 = scalar_lea.vmem [#allocation7], %s678_s21  ;;  %s1100_s16 = scalar_lea.sflag [#allocation8], %s199_s15 }
  0x29   : > { %s1084_s22 = scalar_select %p73_p3, %s933_s0, %s75_s12  }
  0x2a   : > { %s212_s8 = sshll.u32 %s203_s6, 4  ;;  %p1088_p6 = pnand %p680_p4, %p238_p5  ;;  %s1092_s8 = int_to_ptr.vmem [resolvable:$true] %s212_s8 }
  0x2b   : > { %p857_p9 = pneg %p1075_p2 }
  0x2c   : > { %p205_p7 = scmp.gt.s32.totalorder %s204_s23, 0  ;;  %s860_s23 = scalar_lea.hbm %s1223_s2, 4096 }
  0x2e   : > { %s206_s11 = scalar_select %p205_p7, %s945_s27, 0 }
  0x30   : > { %s679_s13 = sshll.u32 %s206_s11, 6 }
  0x31   : > { %s1098_s12 = scalar_lea.hbm %s1223_s2, %s679_s13 }
  0x32   : > { %s855_s18 = scalar_lea.hbm %s1098_s12, 1024  ;;  %p861_p13 = scmp.lt.u32.totalorder %s1098_s12, %s1223_s2 }
  0x33   : > { %p856_p8 = scmp.ne.s32.totalorder %s1098_s12, %s855_s18  ;;  %p862_p0 = scmp.lt.u32.totalorder %s860_s23, %s855_s18 }
  0x34   : > { %p864_p3 = scmp.lt.u32.totalorder %s855_s18, %s1098_s12 }
  0x35   : > { %p858_p10 = pnand %p857_p9, %p856_p8  ;;  %p863_p1 = por %p862_p0, %p861_p13 }
  0x37   : > { %p859_p11 = pneg %p858_p10  ;;  %p865_p4 = por %p864_p3, %p863_p1 }
  0x39   : > { %p866_p5 = pnand %p865_p4, %p859_p11 }
  0x3b   : > { %869 = shalt.err (!%p866_p5)
}
  0x3c   : > { %s870_s15 = scalar_lea.vmem %s1092_s8, 1024  ;;  %s956_s13 = smov [#allocation7]  }
  0x3d   : > { %p871_p7 = scmp.ne.s32.totalorder %s1092_s8, %s870_s15  ;;  %s875_s14 = sshll.u32 %s956_s13, 4  ;;  %s876_s14 = int_to_ptr.vmem [resolvable:$false] %s875_s14 }
  0x3e   : > { %s877_s19 = scalar_lea.vmem %s876_s14, 2048  ;;  %p878_p12 = scmp.lt.s32.totalorder %s1092_s8, %s876_s14 }
  0x3f   : > { %p873_p8 = pnand %p871_p7, %p857_p9  ;;  %p879_p13 = scmp.lt.s32.totalorder %s877_s19, %s870_s15 }
  0x41   : > { %p874_p10 = pneg %p873_p8  ;;  %p880_p0 = por %p879_p13, %p878_p12 }
  0x43   : > { %p881_p1 = pnand %p880_p0, %p874_p10 }
  0x45   : > { %884 = shalt.err (!%p881_p1)
}
  0x46   : > { %s957_s18 = smov 256   ;;  %s958_s20 = smov 64  }
  0x47   : > { %s959_s21 = smov 4   ;;  %242 = sbr.rel (%p1088_p6) target bundleno = 821 (0x335), region = 36 }
  0x48   : > { %744 = dma.hbm_to_vmem [thread:$0]  (!%p1075_p2), %s1098_s12, 1024, %s1092_s8, %s1100_s16, %s957_s18, %s958_s20, %s959_s21  }
  0x49   : > { %s244_s23 = sand.u32 (!%p1088_p6), 1, %s929_s24   ;;  %p1233_p12 = scmp.ne.s32.totalorder (!%p1088_p6), %s1229_s10, 0 }
  0x4a   : > { %s681_s6 = sshll.u32 (!%p1088_p6), %s244_s23, 6  ;;  %s245_s11 = scalar_lea.sflag (!%p1088_p6), [#allocation8], %s244_s23 }
  0x4b   : > { %s1131_s15 = scalar_lea.vmem (!%p1088_p6), [#allocation7], %s681_s6 }
  0x4e   : > { %920 = dma.done.wait (%p1233_p12), %s245_s11, 1024  }
  0x4f   : > { %922 = vsyncadd (%p1233_p12), %s245_s11, 4294966272  ;;  %s682_s17 = sshll.u32 %s941_s26, 1  ;;  %s1139_s8 = sld [smem:[#allocation6 + %s941_s26]] }
  0x50   : > { %p289_p2 = scmp.lt.s32.totalorder %s682_s17, 3  ;;  %p318_p6 = scmp.eq.s32.totalorder %s937_s25, 0 }
  0x52   : > { %s1252_s17 = smov (!%p289_p2, %s682_s17), 3 }
  0x53   : > { %s683_s9 = sshll.u32 %s1252_s17, 2  ;;  %s685_s12 = sshll.u32 %s1252_s17, 3 }
  0x54   : > { %s1145_s14 = scalar_lea.vmem %s1222_s1, %s683_s9  ;;  %s1150_s18 = scalar_lea.vmem %s1224_s3, %s685_s12 }
  0x55   : > { %p317_p9 = scmp.gt.s32.totalorder %s1139_s8, 0  ;;  %s1156_s21 = scalar_lea.vmem %s1225_s4, %s685_s12 }
  0x56   : > { %s1161_s11 = scalar_lea.vmem %s1226_s5, %s685_s12 }
  0x57   : > { %p319_p11 = pnand %p318_p6, %p317_p9 }
  0x58   : > { %vm323_vm0 = vcmask (!%p319_p11), 7168   ;;  %v960_v0 = vmov (!%p319_p11), -inf   ;;  %v961_v1 = vmov (!%p319_p11), 0.0  }
  0x59   : > { %322 = sbr.rel (%p319_p11) target bundleno = 96 (0x60), region = 44  ;;  %324 = vst.msk [vmem:[#allocation2] sm:$0xff] (!%p319_p11), %vm323_vm0, %v960_v0  ;;  %325 = vst.msk [vmem:[#allocation2 + $0x8] sm:$0xff] (!%p319_p11), %vm323_vm0, %v960_v0 }
  0x5a   : > { %326 = vst.msk [vmem:[#allocation3] sm:$0xff] (!%p319_p11), %vm323_vm0, %v961_v1  ;;  %327 = vst.msk [vmem:[#allocation3 + $0x8] sm:$0xff] (!%p319_p11), %vm323_vm0, %v961_v1 }
  0x5b   : > { %328 = vst.msk [vmem:[#allocation4] sm:$0xff] (!%p319_p11), %vm323_vm0, %v961_v1  ;;  %329 = vst.msk [vmem:[#allocation4 + $0x8] sm:$0xff] (!%p319_p11), %vm323_vm0, %v961_v1 }
  0x60 PF: > { %p690_p3 = scmp.le.s32.totalorder %s1139_s8, 0 }
  0x61   : > { %v822_v2 = vld [vmem:[%s1131_s15] sm:$0xff] (!%p690_p3)   ;;  %v962_v3 = vmov (!%p690_p3), 0.0   ;;  %v823_v4 = vld [vmem:[%s1131_s15 + $0x8] sm:$0xff] (!%p690_p3)   ;;  %vm963_vm1 = vmmov (!%p690_p3), 0   ;;  %v824_v5 = vld [vmem:[%s1131_s15 + $0x10] sm:$0xff] (!%p690_p3)   ;;  %v964_v12 = vmov (!%p690_p3), 0   ;;  %v446_v13 = vlaneseq (!%p690_p3) }
  0x62   : > { %332 = sbr.rel (%p690_p3) target bundleno = 783 (0x30f), region = 48  ;;  %715 = vmatprep.subr.bf16.mxu0 (!%p690_p3), %v962_v3  ;;  %731 = vmatprep.mubr.msk.bf16.mxu0 (!%p690_p3), %vm963_vm1, %v962_v3  ;;  %v825_v6 = vld [vmem:[%s1131_s15 + $0x18] sm:$0xff] (!%p690_p3)   ;;  %v826_v7 = vld [vmem:[%s1131_s15 + $0x20] sm:$0xff] (!%p690_p3)   ;;  %v827_v8 = vld [vmem:[%s1131_s15 + $0x28] sm:$0xff] (!%p690_p3)   ;;  %s700_s17 = sshll.u32 (!%p690_p3), %s937_s25, 7  ;;  %vm494_vm3 = vcmask (!%p690_p3), 7168  }
  0x63   : > { %716 = vmatpush3.bf16.msra.mxu0 (!%p690_p3), %v822_v2  ;;  %v828_v9 = vld [vmem:[%s1131_s15 + $0x30] sm:$0xff] (!%p690_p3)   ;;  %v829_v10 = vld [vmem:[%s1131_s15 + $0x38] sm:$0xff] (!%p690_p3)   ;;  %821 = vset.pattern.permute.xlu0 (!%p690_p3), %v964_v12  ;;  %s449_s9 = ssub.s32 (!%p690_p3), 300, %s700_s17  ;;  %v447_v14 = vand.u32 (!%p690_p3), 127, %v446_v13  ;;  %v503_v22 = vstv (!%p690_p3), %s700_s17  ;;  %v462_v53 = vld [vmem:[#allocation3] sm:$0xff] (!%p690_p3) }
  0x64   : > { %717 = vmatprep.subr.bf16.mxu0 (!%p690_p3), %v962_v3  ;;  %v830_v11 = vld [vmem:[%s1145_s14] sm:$0xff] (!%p690_p3)   ;;  %820 = vset.pattern.permute.xlu1 (!%p690_p3), %v964_v12  ;;  %v450_v15 = vstv (!%p690_p3), %s449_s9  ;;  %v455_v28 = vld [vmem:[#allocation2 + $0x8] sm:$0xff] (!%p690_p3)  ;;  %v463_v57 = vld [vmem:[#allocation3 + $0x8] sm:$0xff] (!%p690_p3) }
  0x65   : > { %vm451_vm2 = vcmp.lt.s32.totalorder (!%p690_p3), %v447_v14, %v450_v15  ;;  %v501_v23 = vld [vmem:[%s1150_s18] sm:$0xff] (!%p690_p3)  ;;  %v502_v31 = vld [vmem:[%s1150_s18 + $0x8] sm:$0xff] (!%p690_p3) }
  0x66   : > { %v504_v24 = vsub.s32 (!%p690_p3), %v501_v23, %v503_v22  ;;  %v454_v25 = vld [vmem:[#allocation2] sm:$0xff] (!%p690_p3)  ;;  %v505_v34 = vsub.s32 (!%p690_p3), %v502_v31, %v503_v22  ;;  %v500_v62 = vld [vmem:[#allocation4 + $0x8] sm:$0xff] (!%p690_p3) }
  0x67   : > { %718 = vmatpush3.bf16.msra.mxu0 (!%p690_p3), %v823_v4  ;;  %v499_v47 = vld [vmem:[#allocation4] sm:$0xff] (!%p690_p3) }
  0x68   : > { %719 = vmatprep.subr.bf16.mxu0 (!%p690_p3), %v962_v3 }
  0x6b   : > { %720 = vmatpush3.bf16.msra.mxu0 %v824_v5 }
  0x6c   : > { %721 = vmatprep.subr.bf16.mxu0 %v962_v3 }
  0x6f   : > { %722 = vmatpush3.bf16.msra.mxu0 %v825_v6 }
  0x70   : > { %723 = vmatprep.subr.bf16.mxu0 %v962_v3 }
  0x73   : > { %724 = vmatpush3.bf16.msra.mxu0 %v826_v7 }
  0x74   : > { %725 = vmatprep.subr.bf16.mxu0 %v962_v3 }
  0x77   : > { %726 = vmatpush3.bf16.msra.mxu0 %v827_v8 }
  0x78   : > { %727 = vmatprep.subr.bf16.mxu0 %v962_v3 }
  0x7b   : > { %728 = vmatpush3.bf16.msra.mxu0 %v828_v9 }
  0x7c   : > { %729 = vmatprep.subr.bf16.mxu0 %v962_v3 }
  0x7f   : > { %730 = vmatpush3.bf16.msra.mxu0 %v829_v10 }
  0x82   : > { %732 = vmatmul.mubr.bf16.vlgmr.msra.gmra.mrb[0].mxu0 %v830_v11 }
 0x155   : > { %v439_v16 = vpop.f32.mrb[0].mxu0 }
 0x156   : > { %v452_v17 = vsel %vm451_vm2, %v439_v16, -1e+30  ;;  %v733_v18 = vpop.f32.mrb[1].mxu0 }
 0x157   : > { %456 = vmax.xlane.f32.xlu0 %v452_v17  ;;  %v442_v19 = vpop.f32.mrb[2].mxu0 }
 0x158   : > { %v734_v20 = vpop.f32.mrb[3].mxu0  ;;  %v453_v21 = vsel %vm451_vm2, %v442_v19, -1e+30 }
 0x15b   : > { %458 = vmax.xlane.f32.xlu0 %v453_v21 }
 0x171   : > { %507 = vperm.xlu0 %821, %v504_v24  }
 0x1e4   : > { %v457_v26 = vpop.xlane.xlu0 %456 }
 0x1e5   : > { %v460_v27 = vmax.f32 %v454_v25, %v457_v26 }
 0x1e7   : > { %v464_v29 = vsub.f32 %v454_v25, %v460_v27  ;;  %497 = vst.msk [vmem:[#allocation2] sm:$0xff] %vm494_vm3, %v460_v27  ;;  %474 = vperm.xlu1 %820, %v460_v27  }
 0x1e8   : > { %v459_v30 = vpop.xlane.xlu0 %458 }
 0x1e9   : > { %v461_v32 = vmax.f32 %v455_v28, %v459_v30  ;;  %v466_v50 = vmul.f32 1.442695, %v464_v29 }
 0x1eb   : > { %v465_v33 = vsub.f32 %v455_v28, %v461_v32  ;;  %498 = vst.msk [vmem:[#allocation2 + $0x8] sm:$0xff] %vm494_vm3, %v461_v32  ;;  %479 = vperm.xlu1 %820, %v461_v32  }
 0x1ed   : > { %v468_v51 = vmul.f32 1.442695, %v465_v33 }
 0x1ef   : > { %510 = vperm.xlu1 %820, %v505_v34  }
 0x1f0   : > { %v508_v35 = vpop.permute.xlu0 %507 }
 0x1f1   : > { %vm512_vm4 = vcmp.eq.s32.totalorder %v447_v14, %v508_v35 }
 0x1f2   : > { %v514_v36 = vsel %vm512_vm4, %v452_v17, 0.0 }
 0x1f3   : > { %516 = vadd.xlane.f32.xlu0 %v514_v36 }
 0x266   : > { %v475_v37 = vpop.permute.xlu1 %474 }
 0x267   : > { %v482_v38 = vsub.f32 %v452_v17, %v475_v37 }
 0x269   : > { %v484_v39 = vmul.f32 1.442695, %v482_v38 }
 0x26a   : > { %v480_v40 = vpop.permute.xlu1 %479 }
 0x26b   : > { %831 = vpow2.f32 %v484_v39  ;;  %v483_v41 = vsub.f32 %v453_v21, %v480_v40 }
 0x26d   : > { %v486_v42 = vmul.f32 1.442695, %v483_v41 }
 0x26e   : > { %v511_v44 = vpop.permute.xlu1 %510 }
 0x26f   : > { %833 = vpow2.f32 %v486_v42  ;;  %vm513_vm5 = vcmp.eq.s32.totalorder %v447_v14, %v511_v44 }
 0x270   : > { %v515_v46 = vsel %vm513_vm5, %v453_v21, 0.0  ;;  %835 = vpow2.f32 %v466_v50 }
 0x271   : > { %837 = vpow2.f32 %v468_v51 }
 0x275   : > { %v832_v43 = vpop.eup %831 }
 0x276   : > { %488 = vadd.xlane.f32.xlu1 %v832_v43 }
 0x279   : > { %v834_v45 = vpop.eup %833 }
 0x27a   : > { %490 = vadd.xlane.f32.xlu1 %v834_v45  ;;  %v836_v52 = vpop.eup %835 }
 0x27b   : > { %v470_v54 = vmul.f32 %v836_v52, %v462_v53  ;;  %v838_v55 = vpop.eup %837 }
 0x27c   : > { %v471_v59 = vmul.f32 %v838_v55, %v463_v57 }
 0x27e   : > { %518 = vadd.xlane.f32.xlu1 %v515_v46 }
 0x280   : > { %v517_v48 = vpop.xlane.xlu0 %516 }
 0x281   : > { %v520_v49 = vadd.f32 %v517_v48, %v499_v47 }
 0x283   : > { %522 = vst.msk [vmem:[#allocation4] sm:$0xff] %vm494_vm3, %v520_v49 }
 0x303   : > { %v489_v56 = vpop.xlane.xlu1 %488 }
 0x304   : > { %v492_v58 = vadd.f32 %v489_v56, %v470_v54 }
 0x306   : > { %495 = vst.msk [vmem:[#allocation3] sm:$0xff] %vm494_vm3, %v492_v58 }
 0x307   : > { %v491_v60 = vpop.xlane.xlu1 %490 }
 0x308   : > { %v493_v61 = vadd.f32 %v491_v60, %v471_v59 }
 0x30a   : > { %496 = vst.msk [vmem:[#allocation3 + $0x8] sm:$0xff] %vm494_vm3, %v493_v61 }
 0x30b   : > { %v519_v63 = vpop.xlane.xlu1 %518 }
 0x30c   : > { %v521_v0 = vadd.f32 %v519_v63, %v500_v62 }
 0x30e   : > { %523 = vst.msk [vmem:[#allocation4 + $0x8] sm:$0xff] %vm494_vm3, %v521_v0 }
 0x30f PF: > { %p701_p4 = scmp.ne.s32.totalorder %s937_s25, 3 }
 0x311   : > { %527 = sbr.rel (%p701_p4) target bundleno = 821 (0x335), region = 52 }
 0x318   : > { %530 = sbr.rel (%p690_p3) target bundleno = 814 (0x32e), region = 56  ;;  %v533_v1 = vld [vmem:[#allocation3] sm:$0xff] (!%p690_p3)  ;;  %v534_v2 = vld [vmem:[#allocation3 + $0x8] sm:$0xff] (!%p690_p3)  ;;  %v531_v4 = vld [vmem:[#allocation2] sm:$0xff] (!%p690_p3)  ;;  %vm549_vm6 = vcmask (!%p690_p3), 7168  }
 0x319   : > { %839 = vlog2.f32 (!%p690_p3), %v533_v1  ;;  %v532_v7 = vld [vmem:[#allocation2 + $0x8] sm:$0xff] (!%p690_p3)  ;;  %v541_v8 = vld [vmem:[#allocation4] sm:$0xff] (!%p690_p3) }
 0x31a   : > { %841 = vlog2.f32 (!%p690_p3), %v534_v2  ;;  %v542_v11 = vld [vmem:[#allocation4 + $0x8] sm:$0xff] (!%p690_p3)  ;;  %v545_v12 = vld [vmem:[%s1156_s21] sm:$0xff] (!%p690_p3) }
 0x31b   : > { %v546_v15 = vld [vmem:[%s1156_s21 + $0x8] sm:$0xff] (!%p690_p3) }
 0x323   : > { %v840_v3 = vpop.eup %839 }
 0x324   : > { %v842_v5 = vpop.eup %841  ;;  %v536_v6 = vmul.f32 0.6931472, %v840_v3 }
 0x325   : > { %v538_v9 = vmul.f32 0.6931472, %v842_v5 }
 0x326   : > { %v539_v10 = vadd.f32 %v536_v6, %v531_v4 }
 0x327   : > { %v540_v13 = vadd.f32 %v538_v9, %v532_v7 }
 0x328   : > { %v543_v14 = vsub.f32 %v539_v10, %v541_v8 }
 0x329   : > { %v544_v16 = vsub.f32 %v540_v13, %v542_v11 }
 0x32a   : > { %v547_v17 = vmul.f32 %v545_v12, %v543_v14 }
 0x32b   : > { %v548_v18 = vmul.f32 %v546_v15, %v544_v16 }
 0x32c   : > { %550 = vst.msk [vmem:[%s1161_s11] sm:$0xff] %vm549_vm6, %v547_v17 }
 0x32d   : > { %551 = vst.msk [vmem:[%s1161_s11 + $0x8] sm:$0xff] %vm549_vm6, %v548_v18 }
 0x32e PF: > { %555 = sbr.rel (%p317_p9) target bundleno = 821 (0x335), region = 60  ;;  %vm556_vm7 = vcmask (!%p317_p9), 7168   ;;  %v965_v19 = vmov (!%p317_p9), 0.0  }
 0x32f   : > { %557 = vst.msk [vmem:[%s1161_s11] sm:$0xff] (!%p317_p9), %vm556_vm7, %v965_v19  ;;  %558 = vst.msk [vmem:[%s1161_s11 + $0x8] sm:$0xff] (!%p317_p9), %vm556_vm7, %v965_v19 }
 0x335 PF: > { %s24_s29 = sadd.s32 1, %s953_s29   ;;  %s1234_s23 = smov %s929_s24 }
 0x336   : > { %p21_p5 = scmp.ge.s32.totalorder %s24_s29, 10   ;;  %s1235_s24 = smov %s933_s0 }
 0x337   : > { %s1236_s0 = smov %s1084_s22  ;;  %s1237_s25 = smov %s945_s27 }
 0x338   : > { %s1238_s26 = smov %s949_s28  ;;  %s1239_s27 = smov %s1246_s30 }
 0x339   : > { %s1240_s28 = smov %s1244_s7  ;;  %23 = sbr.rel (!%p21_p5) target bundleno = 20 (0x14), region = 105 }
 0x340   :  { %581 = vsyncpa [#allocation8], 1 }
 0x341   :  { %583 = vsyncpa [#allocation8 + $0x1], 1 }

</bundles_post_ra>
